<compile_context>
chip_gen: v5e
topology: v5e:2x2
jax: 0.10.0
libtpu: 0.0.40
codegen_flags: <defaults>
</compile_context>

<pallas_src>
import functools

import jax
import jax.numpy as jnp
from jax.experimental import pallas as pl
from jax.experimental.pallas import tpu as pltpu


# --------------------------------------------------------------------------- #
# Kernel
# --------------------------------------------------------------------------- #
def _smoe_gate_kernel(x_ref, wt_ref, bias_ref, idx_ref, score_ref, *, lane_dense):
    """One token tile: logits -> balanced top-2 -> 2-way softmax of original logits.

    x_ref:    [TN, D]  native dtype, feeds the MXU directly
    wt_ref:   [D, Ep]  pre-transposed/padded gate weight (resident)
    bias_ref: [1, Ep]  -(avg_probs*alpha) on real experts, -inf on padded cols
    idx_ref / score_ref: [top_k, TN] if lane_dense else [TN, top_k]
    """
    logits = jnp.dot(x_ref[...], wt_ref[...],
                     preferred_element_type=jnp.float32)              # [TN, Ep]
    balanced = logits + bias_ref[...]                                  # [TN, Ep]

    tn, ep = logits.shape
    e_idx = jax.lax.broadcasted_iota(jnp.int32, (tn, ep), 1)
    neg_inf = jnp.float32(-jnp.inf)

    # --- top-2 over balanced logits: argmax, mask, argmax (ties -> lowest idx)
    m1 = jnp.max(balanced, axis=-1, keepdims=True)
    i1 = jnp.min(jnp.where(balanced == m1, e_idx, ep), axis=-1, keepdims=True)
    is1 = e_idx == i1                                  # one-hot, reused below
    masked = jnp.where(is1, neg_inf, balanced)
    m2 = jnp.max(masked, axis=-1, keepdims=True)
    i2 = jnp.min(jnp.where(masked == m2, e_idx, ep), axis=-1, keepdims=True)
    is2 = e_idx == i2

    # --- gather the ORIGINAL logits at the two selected experts
    l1 = jnp.sum(jnp.where(is1, logits, 0.0), axis=-1, keepdims=True)
    l2 = jnp.sum(jnp.where(is2, logits, 0.0), axis=-1, keepdims=True)

    # --- softmax over a row with exactly two finite entries == 2-way sigmoid
    d = l1 - l2
    e = jnp.exp(-jnp.abs(d))
    p_hi = pl.reciprocal(1.0 + e, approx=False)   # exact: keeps 1e-5 ref parity
    s1 = jnp.where(d >= 0, p_hi, 1.0 - p_hi)
    s2 = 1.0 - s1

    idx = jnp.concatenate([i1, i2], axis=-1).astype(jnp.int32)         # [TN, 2]
    scores = jnp.concatenate([s1, s2], axis=-1).astype(jnp.float32)    # [TN, 2]
    if lane_dense:
        # Lane-dense store slab [top_k, TN]: avoids TN/8 nearly-empty vst.msk
        # partial stores per output per tile (visible when D is small).
        idx_ref[...] = idx.T
        score_ref[...] = scores.T
    else:
        idx_ref[...] = idx
        score_ref[...] = scores


# --------------------------------------------------------------------------- #
# Planning / parameter prep
# --------------------------------------------------------------------------- #
def _round_up(v, m):
    return ((v + m - 1) // m) * m


def _vmem_plan(n, d, e_pad, x_itemsize, w_itemsize):
    """Generation-aware TILE_N / vmem_limit plan.

    v5e/v6e have 128 MiB VMEM, v7x 64 MiB per TensorCore, so budgets come from
    pltpu.get_tpu_info() instead of fixed constants.  Accounts for the resident
    weight/bias, the double-buffered x tile, ~6 f32 [TILE_N, E_pad] in-kernel
    intermediates and the output buffers.
    """
    try:
        vmem_cap = int(pltpu.get_tpu_info().vmem_capacity_bytes)
    except Exception:                       # conservative default: v7x per-TC
        vmem_cap = 64 * 1024 * 1024
    # ~40 MiB on v7x, ~80 MiB on v5e/v6e.
    vmem_limit = min((vmem_cap * 5) // 8, 96 * 1024 * 1024)
    budget = vmem_limit - 2 * 1024 * 1024   # headroom for Mosaic internals

    fixed = 2 * d * e_pad * w_itemsize + 2 * e_pad * 4   # weight (2x safety) + bias
    if fixed > budget:
        # TODO(synk): E-tiled running-top-2 path for weights too big for VMEM.
        raise NotImplementedError(
            "gate weight does not fit the per-core VMEM budget; E-tiling needed")

    per_token = (2 * d * x_itemsize          # double-buffered x tile
                 + 6 * e_pad * 4             # f32 [TILE_N, E_pad] intermediates
                 + 2 * 2 * 2 * 4)            # double-buffered idx/score tiles
    tile = (budget - fixed) // per_token
    tile = min(tile, 4096)                   # per review: allow 2048-4096 tokens

    if tile >= n:
        if n >= 256:
            # Keep >=2 grid steps so ("parallel",) shards tokens across both
            # v7x TensorCores instead of leaving one idle.
            tile = _round_up(pl.cdiv(n, 2), 128)
        else:
            tile = n                          # single full block for tiny inputs
    else:
        tile = max(128, (tile // 128) * 128)  # 128-aligned for lane-dense stores
    return int(tile), int(vmem_limit)


def prepare_smoe_gate_params(weight, avg_probs, *, alpha=1.0):
    """One-time prep (per weight / avg_probs update, NOT per forward).

    weight: [tot_expert, d_model] (nn.Linear layout); avg_probs: [tot_expert].
    Returns (wt [d_model, E_pad], bias [1, E_pad]).  Experts padded to a full
    128-lane vreg (not 256: the kernel is HBM-bound on x); padded columns get
    zero weights and a -inf bias so they can never be selected.
    """
    e, d = weight.shape
    e_pad = max(128, _round_up(e, 128))
    wt = jnp.zeros((d, e_pad), weight.dtype).at[:, :e].set(weight.T)
    bias = jnp.full((1, e_pad), -jnp.inf, dtype=jnp.float32)
    bias = bias.at[0, :e].set(-(avg_probs.astype(jnp.float32) * float(alpha)))
    return wt, bias


# --------------------------------------------------------------------------- #
# pallas_call wrapper
# --------------------------------------------------------------------------- #
def _build_gate_call(n, d, e_pad, x_item, w_item, tile_n, vmem_limit,
                     lane_dense, single_buffer_resident, top_k):
    kernel = functools.partial(_smoe_gate_kernel, lane_dense=lane_dense)
    grid = (pl.cdiv(n, tile_n),)             # ragged last block: no copy of x

    resident_kw = ({"pipeline_mode": pl.Buffered(1)}
                   if single_buffer_resident else {})
    in_specs = [
        pl.BlockSpec((tile_n, d), lambda i: (i, 0)),
        # Resident operands: constant index_map -> fetched once; single buffer
        # frees VMEM that buys a larger token tile.
        pl.BlockSpec((d, e_pad), lambda i: (0, 0), **resident_kw),
        pl.BlockSpec((1, e_pad), lambda i: (0, 0), **resident_kw),
    ]
    if lane_dense:
        out_shape = (jax.ShapeDtypeStruct((top_k, n), jnp.int32),
                     jax.ShapeDtypeStruct((top_k, n), jnp.float32))
        out_specs = (pl.BlockSpec((top_k, tile_n), lambda i: (0, i)),
                     pl.BlockSpec((top_k, tile_n), lambda i: (0, i)))
    else:
        out_shape = (jax.ShapeDtypeStruct((n, top_k), jnp.int32),
                     jax.ShapeDtypeStruct((n, top_k), jnp.float32))
        out_specs = (pl.BlockSpec((tile_n, top_k), lambda i: (i, 0)),
                     pl.BlockSpec((tile_n, top_k), lambda i: (i, 0)))

    return pl.pallas_call(
        kernel,
        out_shape=out_shape,
        grid=grid,
        in_specs=in_specs,
        out_specs=out_specs,
        compiler_params=pltpu.CompilerParams(
            # Token axis is embarrassingly parallel -> shards across v7x TCs.
            dimension_semantics=("parallel",),
            vmem_limit_bytes=int(vmem_limit),
        ),
        cost_estimate=pl.CostEstimate(
            flops=2 * n * d * e_pad,
            transcendentals=n,
            bytes_accessed=(n * d * x_item + d * e_pad * w_item + e_pad * 4
                            + n * top_k * (4 + 4)),
        ),
    )


def smoe_reg_gate(x, wt, bias, *, top_k=2, lane_dense=None):
    """Eval-mode SMoE_Reg gate.  x: [N, D]; (wt, bias) from prepare_smoe_gate_params.

    Returns (top_k_indices [N, top_k] int32, top_k_scores [N, top_k] float32).
    """
    assert top_k == 2, "kernel implements top_k=2 (module default)"
    n, d = x.shape
    d_w, e_pad = wt.shape
    assert d_w == d and e_pad % 128 == 0, "wt must come from prepare_smoe_gate_params"
    if lane_dense is None:
        # Store-side layout only matters when D is small enough that the x read
        # no longer dominates HBM traffic.
        lane_dense = d <= 1024

    x_item = jnp.dtype(x.dtype).itemsize
    w_item = jnp.dtype(wt.dtype).itemsize
    tile_n, vmem_limit = _vmem_plan(n, d, e_pad, x_item, w_item)

    def run(ld, single_buf):
        call = _build_gate_call(n, d, e_pad, x_item, w_item, tile_n, vmem_limit,
                                ld, single_buf, top_k)
        idx, scores = call(x, wt, bias)
        if ld:
            idx, scores = idx.T, scores.T   # tiny [top_k, N] -> [N, top_k]
        return idx, scores

    try:
        return run(lane_dense, True)
    except Exception:
        # Compatibility fallback (numerically identical): row-major output
        # blocks and default double-buffering, for toolchains without small
        # in-kernel transpose or pl.Buffered(1) support.
        return run(False, False)


# --------------------------------------------------------------------------- #
# Pure-JAX reference (mirrors the PyTorch eval-mode forward) and self-test
# --------------------------------------------------------------------------- #
def _reference(x, weight, avg_probs, alpha=1.0, top_k=2):
    logits = x.astype(jnp.float32) @ weight.T.astype(jnp.float32)
    balanced = logits - avg_probs[None, :] * alpha
    _, idx = jax.lax.top_k(balanced, top_k)                   # descending
    e = logits.shape[-1]
    keep = jnp.any(idx[..., None] == jnp.arange(e)[None, None, :], axis=1)
    gating = jnp.where(keep, logits, -jnp.inf)                # scatter of logits
    probs = jax.nn.softmax(gating, axis=-1)
    scores = jnp.take_along_axis(probs, idx, axis=-1)
    return idx, scores


if __name__ == "__main__":
    # Shapes consistent with the module: d_model=32, num_expert=4, world_size=1
    # -> tot_expert=4, top_k=2.
    d_model, num_expert, world_size, top_k = 32, 4, 1, 2
    tot_expert = num_expert * world_size
    alpha = 1.0

    key = jax.random.PRNGKey(0)
    kx1, kx2, kw, ka = jax.random.split(key, 4)
    # nn.Linear(d_model, tot_expert, bias=False) weight: [tot_expert, d_model].
    weight = jax.random.normal(kw, (tot_expert, d_model), dtype=jnp.float32) * 0.1
    # Registered buffer avg_probs (zeros at init; small values to exercise it).
    avg_probs = jax.random.uniform(ka, (tot_expert,), dtype=jnp.float32) * 0.1

    # Hoisted per-weight-update prep (NOT per forward), reused for both batches.
    wt, bias = prepare_smoe_gate_params(weight, avg_probs, alpha=alpha)

    def check(x):
        idx, scores = smoe_reg_gate(x, wt, bias, top_k=top_k)
        jax.block_until_ready((idx, scores))
        ref_idx, ref_scores = _reference(x, weight, avg_probs,
                                         alpha=alpha, top_k=top_k)
        assert idx.shape == (x.shape[0], top_k)
        assert scores.shape == (x.shape[0], top_k)
        assert jnp.array_equal(jnp.sort(idx, axis=-1), jnp.sort(ref_idx, axis=-1))
        assert jnp.allclose(jnp.sort(scores, axis=-1),
                            jnp.sort(ref_scores, axis=-1), atol=1e-5, rtol=1e-5)

    # Tiny batch (single grid step) and a ragged multi-step batch (exercises the
    # cdiv grid with a partial last block -- no padded copy of x is made).
    check(jax.random.normal(kx1, (8, d_model), dtype=jnp.float32))
    check(jax.random.normal(kx2, (300, d_model), dtype=jnp.float32))

    print("KERNEL_OK")
</pallas_src>

<mosaic_0001>
module attributes {stable_mosaic.version = 11 : i64} {
  func.func @_smoe_gate_kernel(%arg0: i32, %arg1: memref<8x32xf32, #tpu.memory_space<vmem>>, %arg2: memref<32x128xf32, #tpu.memory_space<vmem>>, %arg3: memref<1x128xf32, #tpu.memory_space<vmem>>, %arg4: memref<2x8xi32, #tpu.memory_space<vmem>>, %arg5: memref<2x8xf32, #tpu.memory_space<vmem>>) attributes {dimension_semantics = [#tpu.dimension_semantics<parallel>], iteration_bounds = array<i64: 1>, scalar_prefetch = 0 : i64, scratch_operands = 0 : i64, tpu.core_type = #tpu.core_type<tc>, window_params = [{transform_indices = @transform_0, window_bounds = array<i64: 8, 32>}, {pipeline_mode = #tpu.pipeline_mode<synchronous>, transform_indices = @transform_1, window_bounds = array<i64: 32, 128>}, {pipeline_mode = #tpu.pipeline_mode<synchronous>, transform_indices = @transform_2, window_bounds = array<i64: 1, 128>}, {transform_indices = @transform_3, window_bounds = array<i64: 2, 8>}, {transform_indices = @transform_4, window_bounds = array<i64: 2, 8>}]} {
    %c0 = arith.constant 0 : index
    %c0_0 = arith.constant 0 : index
    %0 = vector.load %arg1[%c0, %c0_0] : memref<8x32xf32, #tpu.memory_space<vmem>>, vector<8x32xf32>
    %c0_1 = arith.constant 0 : index
    %c0_2 = arith.constant 0 : index
    %1 = vector.load %arg2[%c0_1, %c0_2] : memref<32x128xf32, #tpu.memory_space<vmem>>, vector<32x128xf32>
    %cst = arith.constant dense<0.000000e+00> : vector<8x128xf32>
    %2 = tpu.matmul %0, %1, %cst {dimension_numbers = #tpu.dot_dimension_numbers<[1], [0], [0], [1], [0, 0, 1, 1], [], []>} : vector<8x32xf32>, vector<32x128xf32>, vector<8x128xf32> -> vector<8x128xf32>
    %c0_3 = arith.constant 0 : index
    %c0_4 = arith.constant 0 : index
    %3 = vector.load %arg3[%c0_3, %c0_4] : memref<1x128xf32, #tpu.memory_space<vmem>>, vector<1x128xf32>
    %4 = vector.broadcast %3 : vector<1x128xf32> to vector<8x128xf32>
    %5 = arith.addf %2, %4 : vector<8x128xf32>
    %6 = tpu.iota {dimensions = array<i32: 1>} : vector<8x128xi32>
    %cst_5 = arith.constant dense<0xFF800000> : vector<8xf32>
    %7 = vector.multi_reduction <maximumf>, %5, %cst_5 [1] : vector<8x128xf32> to vector<8xf32>
    %8 = vector.shape_cast %7 : vector<8xf32> to vector<8x1xf32>
    %9 = vector.broadcast %8 : vector<8x1xf32> to vector<8x128xf32>
    %10 = arith.cmpf oeq, %5, %9 : vector<8x128xf32>
    %c128_i32 = arith.constant 128 : i32
    %11 = vector.broadcast %c128_i32 : i32 to vector<8x128xi32>
    %12 = arith.select %10, %6, %11 : vector<8x128xi1>, vector<8x128xi32>
    %cst_6 = arith.constant dense<2147483647> : vector<8xi32>
    %13 = vector.multi_reduction <minsi>, %12, %cst_6 [1] : vector<8x128xi32> to vector<8xi32>
    %14 = vector.shape_cast %13 : vector<8xi32> to vector<8x1xi32>
    %15 = vector.broadcast %14 : vector<8x1xi32> to vector<8x128xi32>
    %16 = arith.cmpi eq, %6, %15 : vector<8x128xi32>
    %cst_7 = arith.constant 0xFF800000 : f32
    %17 = vector.broadcast %cst_7 : f32 to vector<8x128xf32>
    %18 = arith.select %16, %17, %5 : vector<8x128xi1>, vector<8x128xf32>
    %cst_8 = arith.constant dense<0xFF800000> : vector<8xf32>
    %19 = vector.multi_reduction <maximumf>, %18, %cst_8 [1] : vector<8x128xf32> to vector<8xf32>
    %20 = vector.shape_cast %19 : vector<8xf32> to vector<8x1xf32>
    %21 = vector.broadcast %20 : vector<8x1xf32> to vector<8x128xf32>
    %22 = arith.cmpf oeq, %18, %21 : vector<8x128xf32>
    %c128_i32_9 = arith.constant 128 : i32
    %23 = vector.broadcast %c128_i32_9 : i32 to vector<8x128xi32>
    %24 = arith.select %22, %6, %23 : vector<8x128xi1>, vector<8x128xi32>
    %cst_10 = arith.constant dense<2147483647> : vector<8xi32>
    %25 = vector.multi_reduction <minsi>, %24, %cst_10 [1] : vector<8x128xi32> to vector<8xi32>
    %26 = vector.shape_cast %25 : vector<8xi32> to vector<8x1xi32>
    %27 = vector.broadcast %26 : vector<8x1xi32> to vector<8x128xi32>
    %28 = arith.cmpi eq, %6, %27 : vector<8x128xi32>
    %cst_11 = arith.constant 0.000000e+00 : f32
    %29 = vector.broadcast %cst_11 : f32 to vector<8x128xf32>
    %30 = arith.select %16, %2, %29 : vector<8x128xi1>, vector<8x128xf32>
    %cst_12 = arith.constant dense<0.000000e+00> : vector<8xf32>
    %31 = vector.multi_reduction <add>, %30, %cst_12 [1] : vector<8x128xf32> to vector<8xf32>
    %32 = vector.shape_cast %31 : vector<8xf32> to vector<8x1xf32>
    %cst_13 = arith.constant 0.000000e+00 : f32
    %33 = vector.broadcast %cst_13 : f32 to vector<8x128xf32>
    %34 = arith.select %28, %2, %33 : vector<8x128xi1>, vector<8x128xf32>
    %cst_14 = arith.constant dense<0.000000e+00> : vector<8xf32>
    %35 = vector.multi_reduction <add>, %34, %cst_14 [1] : vector<8x128xf32> to vector<8xf32>
    %36 = vector.shape_cast %35 : vector<8xf32> to vector<8x1xf32>
    %37 = arith.subf %32, %36 : vector<8x1xf32>
    %38 = math.absf %37 : vector<8x1xf32>
    %cst_15 = arith.constant 0.000000e+00 : f32
    %39 = vector.broadcast %cst_15 : f32 to vector<8x1xf32>
    %40 = arith.subf %39, %38 : vector<8x1xf32>
    %41 = math.exp %40 : vector<8x1xf32>
    %cst_16 = arith.constant 1.000000e+00 : f32
    %42 = vector.broadcast %cst_16 : f32 to vector<8x1xf32>
    %43 = arith.addf %42, %41 : vector<8x1xf32>
    %44 = tpu.reciprocal %43 : vector<8x1xf32> -> vector<8x1xf32>
    %cst_17 = arith.constant 0.000000e+00 : f32
    %45 = vector.broadcast %cst_17 : f32 to vector<8x1xf32>
    %46 = arith.cmpf oge, %37, %45 : vector<8x1xf32>
    %cst_18 = arith.constant 1.000000e+00 : f32
    %47 = vector.broadcast %cst_18 : f32 to vector<8x1xf32>
    %48 = arith.subf %47, %44 : vector<8x1xf32>
    %49 = arith.select %46, %44, %48 : vector<8x1xi1>, vector<8x1xf32>
    %cst_19 = arith.constant 1.000000e+00 : f32
    %50 = vector.broadcast %cst_19 : f32 to vector<8x1xf32>
    %51 = arith.subf %50, %49 : vector<8x1xf32>
    %52 = tpu.concatenate %14, %26 in 1 : vector<8x1xi32>, vector<8x1xi32> -> vector<8x2xi32>
    %53 = tpu.concatenate %49, %51 in 1 : vector<8x1xf32>, vector<8x1xf32> -> vector<8x2xf32>
    %54 = tpu.transpose %52, [1, 0] : vector<8x2xi32> -> vector<2x8xi32>
    %c0_20 = arith.constant 0 : index
    %c0_21 = arith.constant 0 : index
    %55 = vector.load %arg4[%c0_20, %c0_21] : memref<2x8xi32, #tpu.memory_space<vmem>>, vector<2x8xi32>
    tpu.vector_store %arg4[%c0_20, %c0_21], %54 {strides = array<i32>} : memref<2x8xi32, #tpu.memory_space<vmem>>, vector<2x8xi32>,
    %56 = tpu.transpose %53, [1, 0] : vector<8x2xf32> -> vector<2x8xf32>
    %c0_22 = arith.constant 0 : index
    %c0_23 = arith.constant 0 : index
    %57 = vector.load %arg5[%c0_22, %c0_23] : memref<2x8xf32, #tpu.memory_space<vmem>>, vector<2x8xf32>
    tpu.vector_store %arg5[%c0_22, %c0_23], %56 {strides = array<i32>} : memref<2x8xf32, #tpu.memory_space<vmem>>, vector<2x8xf32>,
    return
  }
  func.func @transform_0(%arg0: i32) -> (i32, i32) {
    %c0_i32 = arith.constant 0 : i32
    %c0_i32_0 = arith.constant 0 : i32
    return %arg0, %c0_i32 : i32, i32
  }
  func.func @transform_1(%arg0: i32) -> (i32, i32) {
    %c0_i32 = arith.constant 0 : i32
    %c0_i32_0 = arith.constant 0 : i32
    %c0_i32_1 = arith.constant 0 : i32
    return %c0_i32, %c0_i32_0 : i32, i32
  }
  func.func @transform_2(%arg0: i32) -> (i32, i32) {
    %c0_i32 = arith.constant 0 : i32
    %c0_i32_0 = arith.constant 0 : i32
    %c0_i32_1 = arith.constant 0 : i32
    return %c0_i32, %c0_i32_0 : i32, i32
  }
  func.func @transform_3(%arg0: i32) -> (i32, i32) {
    %c0_i32 = arith.constant 0 : i32
    %c0_i32_0 = arith.constant 0 : i32
    return %c0_i32, %arg0 : i32, i32
  }
  func.func @transform_4(%arg0: i32) -> (i32, i32) {
    %c0_i32 = arith.constant 0 : i32
    %c0_i32_0 = arith.constant 0 : i32
    return %c0_i32, %arg0 : i32, i32
  }
}

module attributes {stable_mosaic.version = 11 : i64} {
  func.func @_smoe_gate_kernel(%arg0: i32, %arg1: memref<8x32xf32, #tpu.memory_space<vmem>>, %arg2: memref<32x128xf32, #tpu.memory_space<vmem>>, %arg3: memref<1x128xf32, #tpu.memory_space<vmem>>, %arg4: memref<8x2xi32, #tpu.memory_space<vmem>>, %arg5: memref<8x2xf32, #tpu.memory_space<vmem>>) attributes {dimension_semantics = [#tpu.dimension_semantics<parallel>], iteration_bounds = array<i64: 1>, scalar_prefetch = 0 : i64, scratch_operands = 0 : i64, tpu.core_type = #tpu.core_type<tc>, window_params = [{transform_indices = @transform_0, window_bounds = array<i64: 8, 32>}, {pipeline_mode = #tpu.pipeline_mode<synchronous>, transform_indices = @transform_1, window_bounds = array<i64: 32, 128>}, {pipeline_mode = #tpu.pipeline_mode<synchronous>, transform_indices = @transform_2, window_bounds = array<i64: 1, 128>}, {transform_indices = @transform_3, window_bounds = array<i64: 8, 2>}, {transform_indices = @transform_4, window_bounds = array<i64: 8, 2>}]} {
    %c0 = arith.constant 0 : index
    %c0_0 = arith.constant 0 : index
    %0 = vector.load %arg1[%c0, %c0_0] : memref<8x32xf32, #tpu.memory_space<vmem>>, vector<8x32xf32>
    %c0_1 = arith.constant 0 : index
    %c0_2 = arith.constant 0 : index
    %1 = vector.load %arg2[%c0_1, %c0_2] : memref<32x128xf32, #tpu.memory_space<vmem>>, vector<32x128xf32>
    %cst = arith.constant dense<0.000000e+00> : vector<8x128xf32>
    %2 = tpu.matmul %0, %1, %cst {dimension_numbers = #tpu.dot_dimension_numbers<[1], [0], [0], [1], [0, 0, 1, 1], [], []>} : vector<8x32xf32>, vector<32x128xf32>, vector<8x128xf32> -> vector<8x128xf32>
    %c0_3 = arith.constant 0 : index
    %c0_4 = arith.constant 0 : index
    %3 = vector.load %arg3[%c0_3, %c0_4] : memref<1x128xf32, #tpu.memory_space<vmem>>, vector<1x128xf32>
    %4 = vector.broadcast %3 : vector<1x128xf32> to vector<8x128xf32>
    %5 = arith.addf %2, %4 : vector<8x128xf32>
    %6 = tpu.iota {dimensions = array<i32: 1>} : vector<8x128xi32>
    %cst_5 = arith.constant dense<0xFF800000> : vector<8xf32>
    %7 = vector.multi_reduction <maximumf>, %5, %cst_5 [1] : vector<8x128xf32> to vector<8xf32>
    %8 = vector.shape_cast %7 : vector<8xf32> to vector<8x1xf32>
    %9 = vector.broadcast %8 : vector<8x1xf32> to vector<8x128xf32>
    %10 = arith.cmpf oeq, %5, %9 : vector<8x128xf32>
    %c128_i32 = arith.constant 128 : i32
    %11 = vector.broadcast %c128_i32 : i32 to vector<8x128xi32>
    %12 = arith.select %10, %6, %11 : vector<8x128xi1>, vector<8x128xi32>
    %cst_6 = arith.constant dense<2147483647> : vector<8xi32>
    %13 = vector.multi_reduction <minsi>, %12, %cst_6 [1] : vector<8x128xi32> to vector<8xi32>
    %14 = vector.shape_cast %13 : vector<8xi32> to vector<8x1xi32>
    %15 = vector.broadcast %14 : vector<8x1xi32> to vector<8x128xi32>
    %16 = arith.cmpi eq, %6, %15 : vector<8x128xi32>
    %cst_7 = arith.constant 0xFF800000 : f32
    %17 = vector.broadcast %cst_7 : f32 to vector<8x128xf32>
    %18 = arith.select %16, %17, %5 : vector<8x128xi1>, vector<8x128xf32>
    %cst_8 = arith.constant dense<0xFF800000> : vector<8xf32>
    %19 = vector.multi_reduction <maximumf>, %18, %cst_8 [1] : vector<8x128xf32> to vector<8xf32>
    %20 = vector.shape_cast %19 : vector<8xf32> to vector<8x1xf32>
    %21 = vector.broadcast %20 : vector<8x1xf32> to vector<8x128xf32>
    %22 = arith.cmpf oeq, %18, %21 : vector<8x128xf32>
    %c128_i32_9 = arith.constant 128 : i32
    %23 = vector.broadcast %c128_i32_9 : i32 to vector<8x128xi32>
    %24 = arith.select %22, %6, %23 : vector<8x128xi1>, vector<8x128xi32>
    %cst_10 = arith.constant dense<2147483647> : vector<8xi32>
    %25 = vector.multi_reduction <minsi>, %24, %cst_10 [1] : vector<8x128xi32> to vector<8xi32>
    %26 = vector.shape_cast %25 : vector<8xi32> to vector<8x1xi32>
    %27 = vector.broadcast %26 : vector<8x1xi32> to vector<8x128xi32>
    %28 = arith.cmpi eq, %6, %27 : vector<8x128xi32>
    %cst_11 = arith.constant 0.000000e+00 : f32
    %29 = vector.broadcast %cst_11 : f32 to vector<8x128xf32>
    %30 = arith.select %16, %2, %29 : vector<8x128xi1>, vector<8x128xf32>
    %cst_12 = arith.constant dense<0.000000e+00> : vector<8xf32>
    %31 = vector.multi_reduction <add>, %30, %cst_12 [1] : vector<8x128xf32> to vector<8xf32>
    %32 = vector.shape_cast %31 : vector<8xf32> to vector<8x1xf32>
    %cst_13 = arith.constant 0.000000e+00 : f32
    %33 = vector.broadcast %cst_13 : f32 to vector<8x128xf32>
    %34 = arith.select %28, %2, %33 : vector<8x128xi1>, vector<8x128xf32>
    %cst_14 = arith.constant dense<0.000000e+00> : vector<8xf32>
    %35 = vector.multi_reduction <add>, %34, %cst_14 [1] : vector<8x128xf32> to vector<8xf32>
    %36 = vector.shape_cast %35 : vector<8xf32> to vector<8x1xf32>
    %37 = arith.subf %32, %36 : vector<8x1xf32>
    %38 = math.absf %37 : vector<8x1xf32>
    %cst_15 = arith.constant 0.000000e+00 : f32
    %39 = vector.broadcast %cst_15 : f32 to vector<8x1xf32>
    %40 = arith.subf %39, %38 : vector<8x1xf32>
    %41 = math.exp %40 : vector<8x1xf32>
    %cst_16 = arith.constant 1.000000e+00 : f32
    %42 = vector.broadcast %cst_16 : f32 to vector<8x1xf32>
    %43 = arith.addf %42, %41 : vector<8x1xf32>
    %44 = tpu.reciprocal %43 : vector<8x1xf32> -> vector<8x1xf32>
    %cst_17 = arith.constant 0.000000e+00 : f32
    %45 = vector.broadcast %cst_17 : f32 to vector<8x1xf32>
    %46 = arith.cmpf oge, %37, %45 : vector<8x1xf32>
    %cst_18 = arith.constant 1.000000e+00 : f32
    %47 = vector.broadcast %cst_18 : f32 to vector<8x1xf32>
    %48 = arith.subf %47, %44 : vector<8x1xf32>
    %49 = arith.select %46, %44, %48 : vector<8x1xi1>, vector<8x1xf32>
    %cst_19 = arith.constant 1.000000e+00 : f32
    %50 = vector.broadcast %cst_19 : f32 to vector<8x1xf32>
    %51 = arith.subf %50, %49 : vector<8x1xf32>
    %52 = tpu.concatenate %14, %26 in 1 : vector<8x1xi32>, vector<8x1xi32> -> vector<8x2xi32>
    %53 = tpu.concatenate %49, %51 in 1 : vector<8x1xf32>, vector<8x1xf32> -> vector<8x2xf32>
    %c0_20 = arith.constant 0 : index
    %c0_21 = arith.constant 0 : index
    %54 = vector.load %arg4[%c0_20, %c0_21] : memref<8x2xi32, #tpu.memory_space<vmem>>, vector<8x2xi32>
    tpu.vector_store %arg4[%c0_20, %c0_21], %52 {strides = array<i32>} : memref<8x2xi32, #tpu.memory_space<vmem>>, vector<8x2xi32>,
    %c0_22 = arith.constant 0 : index
    %c0_23 = arith.constant 0 : index
    %55 = vector.load %arg5[%c0_22, %c0_23] : memref<8x2xf32, #tpu.memory_space<vmem>>, vector<8x2xf32>
    tpu.vector_store %arg5[%c0_22, %c0_23], %53 {strides = array<i32>} : memref<8x2xf32, #tpu.memory_space<vmem>>, vector<8x2xf32>,
    return
  }
  func.func @transform_0(%arg0: i32) -> (i32, i32) {
    %c0_i32 = arith.constant 0 : i32
    %c0_i32_0 = arith.constant 0 : i32
    return %arg0, %c0_i32 : i32, i32
  }
  func.func @transform_1(%arg0: i32) -> (i32, i32) {
    %c0_i32 = arith.constant 0 : i32
    %c0_i32_0 = arith.constant 0 : i32
    %c0_i32_1 = arith.constant 0 : i32
    return %c0_i32, %c0_i32_0 : i32, i32
  }
  func.func @transform_2(%arg0: i32) -> (i32, i32) {
    %c0_i32 = arith.constant 0 : i32
    %c0_i32_0 = arith.constant 0 : i32
    %c0_i32_1 = arith.constant 0 : i32
    return %c0_i32, %c0_i32_0 : i32, i32
  }
  func.func @transform_3(%arg0: i32) -> (i32, i32) {
    %c0_i32 = arith.constant 0 : i32
    %c0_i32_0 = arith.constant 0 : i32
    return %arg0, %c0_i32 : i32, i32
  }
  func.func @transform_4(%arg0: i32) -> (i32, i32) {
    %c0_i32 = arith.constant 0 : i32
    %c0_i32_0 = arith.constant 0 : i32
    return %arg0, %c0_i32 : i32, i32
  }
}

</mosaic_0001>

<bundles_post_ra>
// kernel: tpu_custom_call.1
= control target key start
LH: loop header
LB: loop body
LE: loop exit
PB: predicated region body
PF: predicated region fallthrough
CT: control target
= control target key end

     0   :  { %10 = vsyncpa [#allocation3], 0  ;;  %s425_s0 = inlined_call_operand.hbm [shape: f32[8,32], index: 0, kind: input, shape index: {}]   ;;  %s426_s1 = inlined_call_operand.hbm [shape: f32[32,128], index: 1, kind: input, shape index: {}]   ;;  %s427_s2 = inlined_call_operand.vmem [shape: f32[1,128], index: 2, kind: input, shape index: {}]   ;;  %s428_s3 = inlined_call_operand.hbm [shape: s32[2,8], index: 3, kind: output, shape index: {0}]   ;;  %s429_s4 = inlined_call_operand.hbm [shape: f32[2,8], index: 4, kind: output, shape index: {1}]  }
   0x1   :  { %11 = vsyncpa [#allocation6], 0 }
   0x2   :  { %12 = vsyncpa [#allocation4], 0 }
   0x3   :  { %13 = vsyncpa [#allocation9], 0  ;;  %s19_s17 = sshll.u32 %s425_s0, 4  ;;  %s375_s18 = smov [#allocation2]   ;;  %s20_s17 = int_to_ptr.hbm [resolvable:$true] %s19_s17 }
   0x4   :  { %s21_s19 = sshll.u32 %s375_s18, 4  ;;  %s29_s22 = sshll.u32 %s426_s1, 4  ;;  %s22_s19 = int_to_ptr.vmem [resolvable:$true] %s21_s19  ;;  %s30_s22 = int_to_ptr.hbm [resolvable:$true] %s29_s22 }
   0x5   :  { %24 = dma.hbm_to_vmem [thread:$0]  %s20_s17, 128, %s22_s19, [#allocation3]  }
   0x6   :  { %s376_s23 = smov [#allocation5]   ;;  %s377_s25 = smov 128  }
   0x7   :  { %s31_s24 = sshll.u32 %s376_s23, 4  ;;  %s378_s26 = smov 8   ;;  %s32_s24 = int_to_ptr.vmem [resolvable:$true] %s31_s24 }
   0x8   :  { %37 = dma.hbm_to_vmem [thread:$0]  %s30_s22, 512, %s32_s24, [#allocation6], %s377_s25, %s377_s25, %s378_s26  }
   0x9   :  { %367 = dma.done.wait [#allocation3], 128  }
   0xa   :  { %368 = vsyncadd [#allocation3], 4294967168 }
   0xb   :  { %369 = dma.done.wait [#allocation6], 512  }
   0xc   :  { %370 = vsyncadd [#allocation6], 4294966784  ;;  %v52_v0 = vld [vmem:[#allocation5 + $0x18] sm:$0xff]  ;;  %v51_v1 = vld [vmem:[#allocation5 + $0x10] sm:$0xff]  ;;  %vm53_vm0 = vcmask 261120   ;;  %v82_v8 = vlaneseq  ;;  %vm153_vm6 = vcmask 7168  }
   0xd   :  { %69 = vmatpush.msra.mxu0 %v52_v0  ;;  %v50_v2 = vld [vmem:[#allocation5 + $0x8] sm:$0xff]  ;;  %v49_v3 = vld [vmem:[#allocation5] sm:$0xff]  ;;  %v48_v4 = vld [vmem:[#allocation2] sm:$0xff]  ;;  %vm188_vm12 = vcmask 58368   ;;  %s230_s30 = sshll.u32 %s428_s3, 4  ;;  %s380_s5 = smov [#allocation8]   ;;  %s231_s30 = int_to_ptr.hbm [resolvable:$true] %s230_s30 }
   0xe   :  { %v266_v5 = vld [vmem:[%s427_s2] ss:$0 sm:$0xff]  ;;  %v83_v9 = vand.u32 127, %v82_v8  ;;  %s379_s2 = smov [#allocation7]   ;;  %s239_s6 = sshll.u32 %s380_s5, 4  ;;  %s240_s6 = int_to_ptr.vmem [resolvable:$true] %s239_s6 }
   0xf   :  { %70 = vmatpush.msra.mxu0 %v51_v1  ;;  %s228_s27 = sshll.u32 %s379_s2, 4  ;;  %s241_s9 = sshll.u32 %s429_s4, 4  ;;  %s229_s27 = int_to_ptr.vmem [resolvable:$true] %s228_s27  ;;  %s242_s9 = int_to_ptr.hbm [resolvable:$true] %s241_s9 }
  0x11   :  { %71 = vmatpush.msra.mxu0 %v50_v2 }
  0x13   :  { %72 = vmatpush.msra.mxu0 %v49_v3 }
  0x14   :  { %257 = vmatmul.msk.f32.vlgmr.msra.gmra.mxu0 %vm53_vm0, %v48_v4 }
  0x91   :  { %v74_v6 = vpop.f32.mrf.mxu0 }
  0x92   :  { %v81_v7 = vadd.f32 %v266_v5, %v74_v6 }
  0x94   :  { %84 = vmax.xlane.f32.xlu0 %v81_v7 }
 0x107   :  { %v85_v10 = vpop.xlane.xlu0 %84 }
 0x108   :  { %vm86_vm1 = vcmp.eq.f32.partialorder %v81_v7, %v85_v10 }
 0x109   :  { %v87_v11 = vsel %vm86_vm1, %v83_v9, 128 }
 0x10a   :  { %v89_v12 = vshra.s32 %v87_v11, 16  ;;  %v88_v14 = vand.u32 65535, %v87_v11 }
 0x10c   :  { %v91_v13 = vcvt.s32.f32 %v89_v12  ;;  %v90_v16 = vcvt.s32.f32 %v88_v14 }
 0x10e   :  { %92 = vmin.xlane.f32.xlu0 %v91_v13 }
 0x181   :  { %v93_v15 = vpop.xlane.xlu0 %92 }
 0x182   :  { %vm94_vm2 = vcmp.eq.f32.partialorder %v91_v13, %v93_v15  ;;  %v99_v18 = vcvt.f32.s32 %v93_v15 }
 0x183   :  { %v95_v17 = vsel %vm94_vm2, %v90_v16, inf }
 0x184   :  { %96 = vmin.xlane.f32.xlu1 %v95_v17  ;;  %v100_v20 = vshll.u32 %v99_v18, 16 }
 0x1f7   :  { %v97_v19 = vpop.xlane.xlu1 %96 }
 0x1f8   :  { %v98_v21 = vcvt.f32.s32 %v97_v19 }
 0x1fa   :  { %v101_v22 = vadd.s32 %v100_v20, %v98_v21 }
 0x1fc   :  { %vm102_vm3 = vcmp.eq.s32.totalorder %v83_v9, %v101_v22 }
 0x1fd   :  { %v123_v23 = vsel %vm102_vm3, %v74_v6, 0.0  ;;  %v103_v24 = vsel %vm102_vm3, -inf, %v81_v7 }
 0x1fe   :  { %124 = vadd.xlane.f32.xlu0 %v123_v23  ;;  %104 = vmax.xlane.f32.xlu1 %v103_v24 }
 0x271   :  { %v105_v25 = vpop.xlane.xlu1 %104  ;;  %v125_v40 = vpop.xlane.xlu0 %124 }
 0x272   :  { %vm106_vm4 = vcmp.eq.f32.partialorder %v103_v24, %v105_v25 }
 0x273   :  { %v107_v26 = vsel %vm106_vm4, %v83_v9, 128 }
 0x274   :  { %v109_v27 = vshra.s32 %v107_v26, 16  ;;  %v108_v29 = vand.u32 65535, %v107_v26 }
 0x276   :  { %v111_v28 = vcvt.s32.f32 %v109_v27  ;;  %v110_v31 = vcvt.s32.f32 %v108_v29 }
 0x278   :  { %112 = vmin.xlane.f32.xlu2 %v111_v28 }
 0x2eb   :  { %v113_v30 = vpop.xlane.xlu2 %112 }
 0x2ec   :  { %vm114_vm5 = vcmp.eq.f32.partialorder %v111_v28, %v113_v30  ;;  %v119_v33 = vcvt.f32.s32 %v113_v30 }
 0x2ed   :  { %v115_v32 = vsel %vm114_vm5, %v110_v31, inf }
 0x2ee   :  { %116 = vmin.xlane.f32.xlu2 %v115_v32  ;;  %v120_v35 = vshll.u32 %v119_v33, 16 }
 0x361   :  { %v117_v34 = vpop.xlane.xlu2 %116 }
 0x362   :  { %v118_v36 = vcvt.f32.s32 %v117_v34 }
 0x364   :  { %v121_v37 = vadd.s32 %v120_v35, %v118_v36 }
 0x366   :  { %v154_v38 = vsel %vm153_vm6, %v101_v22, %v121_v37  ;;  %vm122_vm7 = vcmp.eq.s32.totalorder %v83_v9, %v121_v37 }
 0x367   :  { %156 = vxpose.xlu2.b32.start.end [1/1] (short) (narrow) %v154_v38, 8  ;;  %v126_v39 = vsel %vm122_vm7, %v74_v6, 0.0 }
 0x368   :  { %127 = vadd.xlane.f32.xlu1 %v126_v39 }
 0x3db   :  { %v128_v41 = vpop.xlane.xlu1 %127 }
 0x3dc   :  { %v129_v42 = vsub.f32 %v125_v40, %v128_v41 }
 0x3de   :  { %v130_v43 = vand.u32 2147483647, %v129_v42  ;;  %vm149_vm13 = vcmp.ge.f32.partialorder %v129_v42, 0.0 }
 0x3e0   :  { %v131_v44 = vsub.f32 0.0, %v130_v43 }
 0x3e2   :  { %v132_v45 = vmul.f32 1.442695, %v131_v44 }
 0x3e4   :  { %267 = vpow2.f32 %v132_v45 }
 0x3ea   :  { %v268_v46 = vpop.eup %267 }
 0x3eb   :  { %v134_v47 = vadd.f32 1.0, %v268_v46 }
 0x3ed   :  { %269 = vrcp.f32 %v134_v47  ;;  %v146_v51 = vand.u32 2147483648, %v134_v47  ;;  %v144_v53 = vand.u32 2147483647, %v134_v47  ;;  %vm140_vm9 = vweird.f32 %v134_v47 }
 0x3ef   :  { %v147_v55 = vor.u32 1.1754944e-38, %v146_v51  ;;  %vm145_vm11 = vcmp.eq.f32.partialorder %v144_v53, 8.507059e+37 }
 0x3f3   :  { %v270_v48 = vpop.eup %269 }
 0x3f4   :  { %v136_v49 = vmul.f32 %v270_v48, %v134_v47  ;;  %vm141_vm8 = vweird.f32 %v270_v48 }
 0x3f5   :  { %vm142_vm10 = vmor %vm140_vm9, %vm141_vm8 }
 0x3f6   :  { %v137_v50 = vsub.f32 1.0, %v136_v49 }
 0x3f8   :  { %v138_v52 = vmul.f32 %v270_v48, %v137_v50 }
 0x3fa   :  { %v139_v54 = vadd.f32 %v270_v48, %v138_v52 }
 0x3fc   :  { %v143_v56 = vsel %vm142_vm10, %v270_v48, %v139_v54 }
 0x3fd   :  { %v148_v57 = vsel %vm145_vm11, %v147_v55, %v143_v56 }
 0x3fe   :  { %v150_v58 = vsub.f32 1.0, %v148_v57 }
 0x400   :  { %v151_v59 = vsel %vm149_vm13, %v148_v57, %v150_v58  ;;  %v172_v60 = vpop.trf.xlu2 }
 0x401   :  { %v152_v61 = vsub.f32 1.0, %v151_v59  ;;  %189 = vst.msk [vmem:[#allocation7] sm:$0x3] %vm188_vm12, %v172_v60 }
 0x402   :  { %233 = dma.vmem_to_hbm [thread:$0]  %s229_s27, 32, %s231_s30, [#allocation4]  }
 0x403   :  { %v155_v62 = vsel %vm153_vm6, %v151_v59, %v152_v61 }
 0x404   :  { %190 = vxpose.xlu0.b32.start.end [1/1] (short) (narrow) %v155_v62, 8 }
 0x4a8   :  { %v206_v63 = vpop.trf.xlu0 }
 0x4a9   :  { %222 = vst.msk [vmem:[#allocation8] sm:$0x3] %vm188_vm12, %v206_v63 }
 0x4aa   :  { %244 = dma.vmem_to_hbm [thread:$0]  %s240_s6, 32, %s242_s9, [#allocation9]  }
 0x4ab   :  { %371 = dma.done.wait [#allocation4], 32  }
 0x4ac   :  { %372 = vsyncadd [#allocation4], 4294967264 }
 0x4ad   :  { %373 = dma.done.wait [#allocation9], 32  }
 0x4ae   :  { %374 = vsyncadd [#allocation9], 4294967264 }
 0x4af   :  { %253 = vsyncpa [#allocation3], 1 }
 0x4b0   :  { %254 = vsyncpa [#allocation6], 1 }
 0x4b1   :  { %255 = vsyncpa [#allocation4], 1 }
 0x4b2   :  { %256 = vsyncpa [#allocation9], 1 }

// kernel: tpu_custom_call.1
= control target key start
LH: loop header
LB: loop body
LE: loop exit
PB: predicated region body
PF: predicated region fallthrough
CT: control target
= control target key end

     0   :  { %10 = vsyncpa [#allocation3], 0  ;;  %s277_s0 = inlined_call_operand.hbm [shape: f32[8,32], index: 0, kind: input, shape index: {}]   ;;  %s278_s1 = inlined_call_operand.hbm [shape: f32[32,128], index: 1, kind: input, shape index: {}]   ;;  %s279_s2 = inlined_call_operand.vmem [shape: f32[1,128], index: 2, kind: input, shape index: {}]   ;;  %s280_s3 = inlined_call_operand.vmem [shape: s32[8,2], index: 3, kind: output, shape index: {0}]   ;;  %s281_s4 = inlined_call_operand.vmem [shape: f32[8,2], index: 4, kind: output, shape index: {1}]  }
   0x1   :  { %s17_s17 = sshll.u32 %s277_s0, 4  ;;  %s18_s17 = int_to_ptr.hbm [resolvable:$true] %s17_s17 }
   0x2   :  { %11 = vsyncpa [#allocation5], 0  ;;  %s229_s18 = smov [#allocation2]   ;;  %s27_s22 = sshll.u32 %s278_s1, 4  ;;  %s28_s22 = int_to_ptr.hbm [resolvable:$true] %s27_s22 }
   0x3   :  { %s19_s19 = sshll.u32 %s229_s18, 4  ;;  %s230_s23 = smov [#allocation4]   ;;  %s20_s19 = int_to_ptr.vmem [resolvable:$true] %s19_s19 }
   0x4   :  { %22 = dma.hbm_to_vmem [thread:$0]  %s18_s17, 128, %s20_s19, [#allocation3]  }
   0x5   :  { %s29_s24 = sshll.u32 %s230_s23, 4  ;;  %s231_s25 = smov 128   ;;  %s30_s24 = int_to_ptr.vmem [resolvable:$true] %s29_s24 }
   0x6   :  { %s232_s26 = smov 8  }
   0x7   :  { %35 = dma.hbm_to_vmem [thread:$0]  %s28_s22, 512, %s30_s24, [#allocation5], %s231_s25, %s231_s25, %s232_s26  }
   0x8   :  { %225 = dma.done.wait [#allocation3], 128  }
   0x9   :  { %226 = vsyncadd [#allocation3], 4294967168 }
   0xa   :  { %227 = dma.done.wait [#allocation5], 512  }
   0xb   :  { %228 = vsyncadd [#allocation5], 4294966784  ;;  %v50_v0 = vld [vmem:[#allocation4 + $0x18] sm:$0xff]  ;;  %v49_v1 = vld [vmem:[#allocation4 + $0x10] sm:$0xff]  ;;  %vm51_vm0 = vcmask 261120   ;;  %v80_v8 = vlaneseq  ;;  %vm151_vm6 = vcmask 7168  }
   0xc   :  { %67 = vmatpush.msra.mxu0 %v50_v0  ;;  %v48_v2 = vld [vmem:[#allocation4 + $0x8] sm:$0xff]  ;;  %v47_v3 = vld [vmem:[#allocation4] sm:$0xff]  ;;  %v46_v4 = vld [vmem:[#allocation2] sm:$0xff]  ;;  %vm154_vm7 = vcmask 15360  }
   0xd   :  { %v172_v5 = vld [vmem:[%s279_s2] ss:$0 sm:$0xff]  ;;  %v81_v9 = vand.u32 127, %v80_v8 }
   0xe   :  { %68 = vmatpush.msra.mxu0 %v49_v1 }
  0x10   :  { %69 = vmatpush.msra.mxu0 %v48_v2 }
  0x12   :  { %70 = vmatpush.msra.mxu0 %v47_v3 }
  0x13   :  { %167 = vmatmul.msk.f32.vlgmr.msra.gmra.mxu0 %vm51_vm0, %v46_v4 }
  0x90   :  { %v72_v6 = vpop.f32.mrf.mxu0 }
  0x91   :  { %v79_v7 = vadd.f32 %v172_v5, %v72_v6 }
  0x93   :  { %82 = vmax.xlane.f32.xlu0 %v79_v7 }
 0x106   :  { %v83_v10 = vpop.xlane.xlu0 %82 }
 0x107   :  { %vm84_vm1 = vcmp.eq.f32.partialorder %v79_v7, %v83_v10 }
 0x108   :  { %v85_v11 = vsel %vm84_vm1, %v81_v9, 128 }
 0x109   :  { %v87_v12 = vshra.s32 %v85_v11, 16  ;;  %v86_v14 = vand.u32 65535, %v85_v11 }
 0x10b   :  { %v89_v13 = vcvt.s32.f32 %v87_v12  ;;  %v88_v16 = vcvt.s32.f32 %v86_v14 }
 0x10d   :  { %90 = vmin.xlane.f32.xlu0 %v89_v13 }
 0x180   :  { %v91_v15 = vpop.xlane.xlu0 %90 }
 0x181   :  { %vm92_vm2 = vcmp.eq.f32.partialorder %v89_v13, %v91_v15  ;;  %v97_v18 = vcvt.f32.s32 %v91_v15 }
 0x182   :  { %v93_v17 = vsel %vm92_vm2, %v88_v16, inf }
 0x183   :  { %94 = vmin.xlane.f32.xlu1 %v93_v17  ;;  %v98_v20 = vshll.u32 %v97_v18, 16 }
 0x1f6   :  { %v95_v19 = vpop.xlane.xlu1 %94 }
 0x1f7   :  { %v96_v21 = vcvt.f32.s32 %v95_v19 }
 0x1f9   :  { %v99_v22 = vadd.s32 %v98_v20, %v96_v21 }
 0x1fb   :  { %vm100_vm3 = vcmp.eq.s32.totalorder %v81_v9, %v99_v22 }
 0x1fc   :  { %v121_v23 = vsel %vm100_vm3, %v72_v6, 0.0  ;;  %v101_v24 = vsel %vm100_vm3, -inf, %v79_v7 }
 0x1fd   :  { %122 = vadd.xlane.f32.xlu0 %v121_v23  ;;  %102 = vmax.xlane.f32.xlu1 %v101_v24 }
 0x270   :  { %v103_v25 = vpop.xlane.xlu1 %102  ;;  %v123_v40 = vpop.xlane.xlu0 %122 }
 0x271   :  { %vm104_vm4 = vcmp.eq.f32.partialorder %v101_v24, %v103_v25 }
 0x272   :  { %v105_v26 = vsel %vm104_vm4, %v81_v9, 128 }
 0x273   :  { %v107_v27 = vshra.s32 %v105_v26, 16  ;;  %v106_v29 = vand.u32 65535, %v105_v26 }
 0x275   :  { %v109_v28 = vcvt.s32.f32 %v107_v27  ;;  %v108_v31 = vcvt.s32.f32 %v106_v29 }
 0x277   :  { %110 = vmin.xlane.f32.xlu2 %v109_v28 }
 0x2ea   :  { %v111_v30 = vpop.xlane.xlu2 %110 }
 0x2eb   :  { %vm112_vm5 = vcmp.eq.f32.partialorder %v109_v28, %v111_v30  ;;  %v117_v33 = vcvt.f32.s32 %v111_v30 }
 0x2ec   :  { %v113_v32 = vsel %vm112_vm5, %v108_v31, inf }
 0x2ed   :  { %114 = vmin.xlane.f32.xlu2 %v113_v32  ;;  %v118_v35 = vshll.u32 %v117_v33, 16 }
 0x360   :  { %v115_v34 = vpop.xlane.xlu2 %114 }
 0x361   :  { %v116_v36 = vcvt.f32.s32 %v115_v34 }
 0x363   :  { %v119_v37 = vadd.s32 %v118_v35, %v116_v36 }
 0x365   :  { %v152_v38 = vsel %vm151_vm6, %v99_v22, %v119_v37  ;;  %vm120_vm8 = vcmp.eq.s32.totalorder %v81_v9, %v119_v37 }
 0x366   :  { %155 = vst.msk [vmem:[%s280_s3] sm:$0xff] %vm154_vm7, %v152_v38  ;;  %v124_v39 = vsel %vm120_vm8, %v72_v6, 0.0 }
 0x367   :  { %125 = vadd.xlane.f32.xlu1 %v124_v39 }
 0x3da   :  { %v126_v41 = vpop.xlane.xlu1 %125 }
 0x3db   :  { %v127_v42 = vsub.f32 %v123_v40, %v126_v41 }
 0x3dd   :  { %v128_v43 = vand.u32 2147483647, %v127_v42  ;;  %vm147_vm13 = vcmp.ge.f32.partialorder %v127_v42, 0.0 }
 0x3df   :  { %v129_v44 = vsub.f32 0.0, %v128_v43 }
 0x3e1   :  { %v130_v45 = vmul.f32 1.442695, %v129_v44 }
 0x3e3   :  { %173 = vpow2.f32 %v130_v45 }
 0x3e9   :  { %v174_v46 = vpop.eup %173 }
 0x3ea   :  { %v132_v47 = vadd.f32 1.0, %v174_v46 }
 0x3ec   :  { %175 = vrcp.f32 %v132_v47  ;;  %v144_v51 = vand.u32 2147483648, %v132_v47  ;;  %v142_v53 = vand.u32 2147483647, %v132_v47  ;;  %vm138_vm10 = vweird.f32 %v132_v47 }
 0x3ee   :  { %v145_v55 = vor.u32 1.1754944e-38, %v144_v51  ;;  %vm143_vm12 = vcmp.eq.f32.partialorder %v142_v53, 8.507059e+37 }
 0x3f2   :  { %v176_v48 = vpop.eup %175 }
 0x3f3   :  { %v134_v49 = vmul.f32 %v176_v48, %v132_v47  ;;  %vm139_vm9 = vweird.f32 %v176_v48 }
 0x3f4   :  { %vm140_vm11 = vmor %vm138_vm10, %vm139_vm9 }
 0x3f5   :  { %v135_v50 = vsub.f32 1.0, %v134_v49 }
 0x3f7   :  { %v136_v52 = vmul.f32 %v176_v48, %v135_v50 }
 0x3f9   :  { %v137_v54 = vadd.f32 %v176_v48, %v136_v52 }
 0x3fb   :  { %v141_v56 = vsel %vm140_vm11, %v176_v48, %v137_v54 }
 0x3fc   :  { %v146_v57 = vsel %vm143_vm12, %v145_v55, %v141_v56 }
 0x3fd   :  { %v148_v58 = vsub.f32 1.0, %v146_v57 }
 0x3ff   :  { %v149_v59 = vsel %vm147_vm13, %v146_v57, %v148_v58 }
 0x400   :  { %v150_v60 = vsub.f32 1.0, %v149_v59 }
 0x402   :  { %v153_v61 = vsel %vm151_vm6, %v149_v59, %v150_v60 }
 0x403   :  { %156 = vst.msk [vmem:[%s281_s4] sm:$0xff] %vm154_vm7, %v153_v61 }
 0x404   :  { %165 = vsyncpa [#allocation3], 1 }
 0x405   :  { %166 = vsyncpa [#allocation5], 1 }

</bundles_post_ra>
